<compile_context>
chip_gen: v5e
topology: v5e:2x2
jax: 0.10.0
libtpu: 0.0.40
codegen_flags: <defaults>
</compile_context>

<pallas_src>
import functools

import jax
import jax.numpy as jnp
from jax import lax
from jax.experimental import pallas as pl
from jax.experimental.pallas import tpu as pltpu

LANE = 128
BSUB = 16  # bf16-packed sublane group: batch tiles rounded to multiples of 16


def _round_up(x: int, m: int) -> int:
    return ((x + m - 1) // m) * m


def _vmem_capacity_bytes() -> int:
    """Per-core VMEM capacity; conservative fallback = v7x's 64 MiB."""
    try:
        info_fn = getattr(pltpu, "get_tpu_info", None)
        if info_fn is not None:
            cap = getattr(info_fn(), "vmem_capacity_bytes", None)
            if cap:
                return int(cap)
    except Exception:
        pass
    return 64 * 1024 * 1024


def _make_tower_kernel(num_cat: int, vocab_pads: tuple):
    """Kernel: fused (embedding one-hot matmuls + Linear1) -> ReLU -> Linear2."""

    def kernel(*refs):
        it = iter(refs)
        num_ref = next(it)                                   # [TB, Dnum] f32
        cat_ref = next(it) if num_cat else None              # [TB, C]    int32
        w1n_ref = next(it)                                   # [Dnum, H_p] bf16
        b1_ref = next(it)                                    # [1, H_p]    f32
        table_refs = [next(it) for _ in range(num_cat)]      # [V_fp, H_p] bf16
        w2_ref = next(it)                                    # [H_p, Dout] bf16
        b2_ref = next(it)                                    # [1, Dout]   f32
        o_ref = next(it)                                     # [TB, Dout]  f32

        tb = num_ref.shape[0]

        # Numerical features: cast to bf16 in-kernel (no host pad/cast pass).
        x = num_ref[...].astype(jnp.bfloat16)
        h = jnp.dot(x, w1n_ref[...], preferred_element_type=jnp.float32)

        # Categorical features: one-hot @ fused-table == gather(E) @ W1_slice,
        # accumulated directly into the hidden activation (f32).
        for f in range(num_cat):
            ids = cat_ref[:, f:f + 1]                                    # [TB, 1]
            iota = lax.broadcasted_iota(jnp.int32, (tb, vocab_pads[f]), 1)
            onehot = jnp.where(iota == ids, 1.0, 0.0).astype(jnp.bfloat16)
            h = h + jnp.dot(onehot, table_refs[f][...],
                            preferred_element_type=jnp.float32)

        # Bias + ReLU in f32, second Linear in bf16 with f32 accumulation.
        h = jnp.maximum(h + b1_ref[...], 0.0)
        out = jnp.dot(h.astype(jnp.bfloat16), w2_ref[...],
                      preferred_element_type=jnp.float32)
        o_ref[...] = (out + b2_ref[...]).astype(o_ref.dtype)

    return kernel


def prepare_tower_params(params, numerical_dim: int):
    """One-time weight preparation (cache this in a serving path).

    Splits W1 into a numerical slab + per-feature fused tables (E_f @ W1_f),
    pads lane dims to 128, casts matmul operands to bf16, keeps biases f32.
    """
    w1, b1, w2, b2 = params["w1"], params["b1"], params["w2"], params["b2"]
    embeddings = params["embeddings"]
    _, H = w1.shape
    Dout = w2.shape[1]
    H_p = _round_up(H, LANE)

    w1n = jnp.zeros((numerical_dim, H_p), jnp.bfloat16)
    w1n = w1n.at[:, :H].set(w1[:numerical_dim].astype(jnp.bfloat16))
    b1p = jnp.zeros((1, H_p), jnp.float32).at[:, :H].set(
        b1.reshape(1, H).astype(jnp.float32))

    tables = []
    off = numerical_dim
    for tbl in embeddings:
        V, E = tbl.shape
        Vp = _round_up(max(V, 1), LANE)
        # Fold the embedding table through its W1 slice (exact in f32).
        fused = tbl.astype(jnp.float32) @ w1[off:off + E].astype(jnp.float32)
        t = jnp.zeros((Vp, H_p), jnp.bfloat16).at[:V, :H].set(
            fused.astype(jnp.bfloat16))
        tables.append(t)
        off += E

    w2p = jnp.zeros((H_p, Dout), jnp.bfloat16).at[:H, :].set(w2.astype(jnp.bfloat16))
    b2p = b2.reshape(1, Dout).astype(jnp.float32)

    return {"w1n": w1n, "b1": b1p, "tables": tuple(tables), "w2": w2p, "b2": b2p}


def tower_model_forward(numerical_feats, categorical_feats, prepared, *,
                        batch_tile: int = 512):
    """Fused TowerModel forward: embeddings + Linear -> ReLU -> Linear.

    numerical_feats:   [B, Dnum] f32
    categorical_feats: [B, C]    int32 (ignored if the model has no cat features)
    Returns [B, Dout] f32.
    """
    B, Dnum = numerical_feats.shape
    tables = prepared["tables"]
    C = len(tables)
    H_p = prepared["w1n"].shape[1]
    Dout = prepared["w2"].shape[1]
    vocab_pads = tuple(int(t.shape[0]) for t in tables)

    # ---- batch tile: multiple of 16, grid >= 2 when B allows, fits VMEM ----
    TB = max(BSUB, min(_round_up(batch_tile, BSUB),
                       _round_up(pl.cdiv(B, 2), BSUB)))
    vmem_cap = _vmem_capacity_bytes()
    budget = int(vmem_cap * 0.7)

    # Grid-invariant weights are fetched once but default-pipelined (x2 bufs).
    w_bytes = 2 * (prepared["w1n"].size * 2 + prepared["w2"].size * 2
                   + sum(int(t.size) * 2 for t in tables)
                   + prepared["b1"].size * 4 + prepared["b2"].size * 4)

    def _tile_bytes(tb):
        io = 2 * (tb * Dnum * 4 + tb * max(C, 1) * 4 + tb * Dout * 4)
        work = tb * (H_p * 4 + H_p * 2 + Dnum * 2 + sum(vocab_pads) * 2 + Dout * 4)
        return io + work

    while TB > BSUB and w_bytes + _tile_bytes(TB) > budget:
        TB = max(BSUB, _round_up(TB // 2, BSUB))

    B_p = _round_up(B, TB)
    grid = (B_p // TB,)

    # Batch-pad rows only (lane dims stay un-padded; cast happens in-kernel).
    # Padded rows produce garbage and are stripped below.
    if B_p != B:
        numerical_feats = jnp.pad(numerical_feats, ((0, B_p - B), (0, 0)))
        if C:
            categorical_feats = jnp.pad(categorical_feats, ((0, B_p - B), (0, 0)))

    def _const(shape):  # grid-invariant -> DMA'd once, VMEM-resident
        return pl.BlockSpec(shape, lambda i: (0, 0))

    in_specs = [pl.BlockSpec((TB, Dnum), lambda i: (i, 0))]
    inputs = [numerical_feats]
    if C:
        in_specs.append(pl.BlockSpec((TB, C), lambda i: (i, 0)))
        inputs.append(categorical_feats.astype(jnp.int32))
    in_specs += [_const(prepared["w1n"].shape), _const(prepared["b1"].shape)]
    inputs += [prepared["w1n"], prepared["b1"]]
    for t in tables:
        in_specs.append(_const(t.shape))
        inputs.append(t)
    in_specs += [_const(prepared["w2"].shape), _const(prepared["b2"].shape)]
    inputs += [prepared["w2"], prepared["b2"]]

    kernel = _make_tower_kernel(C, vocab_pads)

    # Advisory cost (padded dims -> slightly overstated; harmless for scheduling).
    flops = 2 * B_p * (Dnum * H_p + sum(vocab_pads) * H_p + H_p * Dout)
    bytes_accessed = (B_p * Dnum * 4 + B_p * max(C, 1) * 4 + B_p * Dout * 4
                      + sum(int(x.size) * x.dtype.itemsize
                            for x in inputs[(2 if C else 1):]))
    cost = pl.CostEstimate(flops=int(flops), transcendentals=0,
                           bytes_accessed=int(bytes_accessed))

    out = pl.pallas_call(
        kernel,
        out_shape=jax.ShapeDtypeStruct((B_p, Dout), jnp.float32),
        grid_spec=pltpu.PrefetchScalarGridSpec(
            num_scalar_prefetch=0,
            grid=grid,
            in_specs=in_specs,
            out_specs=pl.BlockSpec((TB, Dout), lambda i: (i, 0)),
        ),
        compiler_params=pltpu.CompilerParams(
            # Batch tiles are independent -> shard across TCs (v7x megacore).
            dimension_semantics=("parallel",),
            vmem_limit_bytes=min(int(vmem_cap * 0.9), 100 * 1024 * 1024),
        ),
        cost_estimate=cost,
    )(*inputs)

    return out if B_p == B else out[:B]


def init_params(key, numerical_dim, categorical_vocabs, embedding_dim, output_dim):
    """Deterministic synthetic params mirroring nn.Embedding / nn.Linear shapes."""
    keys = jax.random.split(key, 6 + len(categorical_vocabs))
    total_input_dim = numerical_dim + len(categorical_vocabs) * embedding_dim
    hidden = total_input_dim * 2

    embeddings = []
    for i, (_, vocab) in enumerate(categorical_vocabs.items()):
        embeddings.append(
            jax.random.normal(keys[i], (vocab, embedding_dim), jnp.float32) * 0.05)

    k = len(categorical_vocabs)
    # Linear weights stored pre-transposed to [in, out] for x @ W.
    w1 = jax.random.normal(keys[k + 0], (total_input_dim, hidden), jnp.float32) * 0.05
    b1 = jax.random.normal(keys[k + 1], (hidden,), jnp.float32) * 0.01
    w2 = jax.random.normal(keys[k + 2], (hidden, output_dim), jnp.float32) * 0.05
    b2 = jax.random.normal(keys[k + 3], (output_dim,), jnp.float32) * 0.01

    return {"embeddings": embeddings, "w1": w1, "b1": b1, "w2": w2, "b2": b2}


if __name__ == "__main__":
    key = jax.random.PRNGKey(0)

    batch = 8
    numerical_dim = 16
    categorical_vocabs = {"user_country": 10, "user_device": 20}
    embedding_dim = 8
    output_dim = 32

    kp, kn, kc = jax.random.split(key, 3)
    raw_params = init_params(kp, numerical_dim, categorical_vocabs,
                             embedding_dim, output_dim)
    # One-time weight prep (outside the per-step / jitted function).
    prepared = prepare_tower_params(raw_params, numerical_dim)

    numerical_feats = jax.random.normal(kn, (batch, numerical_dim), jnp.float32)
    categorical_feats = jnp.stack(
        [jax.random.randint(jax.random.fold_in(kc, i), (batch,), 0, vocab)
         for i, vocab in enumerate(categorical_vocabs.values())],
        axis=1).astype(jnp.int32)

    fwd = jax.jit(functools.partial(tower_model_forward, prepared=prepared))
    out = jax.block_until_ready(fwd(numerical_feats, categorical_feats))
    assert out.shape == (batch, output_dim)

    # f32 reference mirroring the PyTorch module (bf16 matmul operands in the
    # kernel -> loose tolerance = the stated precision contract).
    cat_embeds = [jnp.take(t, categorical_feats[:, i], axis=0)
                  for i, t in enumerate(raw_params["embeddings"])]
    all_feats = jnp.concatenate(
        [numerical_feats, jnp.concatenate(cat_embeds, axis=1)], axis=1)
    ref_f32 = (jnp.maximum(all_feats @ raw_params["w1"] + raw_params["b1"], 0.0)
               @ raw_params["w2"] + raw_params["b2"])
    max_err = float(jnp.max(jnp.abs(out - ref_f32)))
    assert jnp.allclose(out, ref_f32, atol=3e-2, rtol=3e-2), max_err

    print("KERNEL_OK")
</pallas_src>

<mosaic_0001>
module attributes {stable_mosaic.version = 11 : i64} {
  func.func @kernel(%arg0: i32, %arg1: memref<16x16xf32, #tpu.memory_space<vmem>>, %arg2: memref<16x2xi32, #tpu.memory_space<vmem>>, %arg3: memref<16x128xbf16, #tpu.memory_space<vmem>>, %arg4: memref<1x128xf32, #tpu.memory_space<vmem>>, %arg5: memref<128x128xbf16, #tpu.memory_space<vmem>>, %arg6: memref<128x128xbf16, #tpu.memory_space<vmem>>, %arg7: memref<128x32xbf16, #tpu.memory_space<vmem>>, %arg8: memref<1x32xf32, #tpu.memory_space<vmem>>, %arg9: memref<16x32xf32, #tpu.memory_space<vmem>>) attributes {dimension_semantics = [#tpu.dimension_semantics<parallel>], iteration_bounds = array<i64: 1>, scalar_prefetch = 0 : i64, scratch_operands = 0 : i64, tpu.core_type = #tpu.core_type<tc>, window_params = [{transform_indices = @transform_0, window_bounds = array<i64: 16, 16>}, {transform_indices = @transform_1, window_bounds = array<i64: 16, 2>}, {pipeline_mode = #tpu.pipeline_mode<synchronous>, transform_indices = @transform_2, window_bounds = array<i64: 16, 128>}, {pipeline_mode = #tpu.pipeline_mode<synchronous>, transform_indices = @transform_3, window_bounds = array<i64: 1, 128>}, {pipeline_mode = #tpu.pipeline_mode<synchronous>, transform_indices = @transform_4, window_bounds = array<i64: 128, 128>}, {pipeline_mode = #tpu.pipeline_mode<synchronous>, transform_indices = @transform_5, window_bounds = array<i64: 128, 128>}, {pipeline_mode = #tpu.pipeline_mode<synchronous>, transform_indices = @transform_6, window_bounds = array<i64: 128, 32>}, {pipeline_mode = #tpu.pipeline_mode<synchronous>, transform_indices = @transform_7, window_bounds = array<i64: 1, 32>}, {transform_indices = @transform_8, window_bounds = array<i64: 16, 32>}]} {
    %c0 = arith.constant 0 : index
    %c0_0 = arith.constant 0 : index
    %0 = vector.load %arg1[%c0, %c0_0] : memref<16x16xf32, #tpu.memory_space<vmem>>, vector<16x16xf32>
    %1 = arith.truncf %0 : vector<16x16xf32> to vector<16x16xbf16>
    %c0_1 = arith.constant 0 : index
    %c0_2 = arith.constant 0 : index
    %2 = vector.load %arg3[%c0_1, %c0_2] : memref<16x128xbf16, #tpu.memory_space<vmem>>, vector<16x128xbf16>
    %cst = arith.constant dense<0.000000e+00> : vector<16x128xf32>
    %3 = tpu.matmul %1, %2, %cst {dimension_numbers = #tpu.dot_dimension_numbers<[1], [0], [0], [1], [0, 0, 1, 1], [], []>} : vector<16x16xbf16>, vector<16x128xbf16>, vector<16x128xf32> -> vector<16x128xf32>
    %c0_3 = arith.constant 0 : index
    %c0_4 = arith.constant 0 : index
    %4 = vector.load %arg2[%c0_3, %c0_4] : memref<16x2xi32, #tpu.memory_space<vmem>>, vector<16x1xi32>
    %5 = tpu.iota {dimensions = array<i32: 1>} : vector<16x128xi32>
    %6 = vector.broadcast %4 : vector<16x1xi32> to vector<16x128xi32>
    %7 = arith.cmpi eq, %5, %6 : vector<16x128xi32>
    %cst_5 = arith.constant 1.000000e+00 : f32
    %cst_6 = arith.constant 0.000000e+00 : f32
    %8 = vector.broadcast %cst_5 : f32 to vector<16x128xf32>
    %9 = vector.broadcast %cst_6 : f32 to vector<16x128xf32>
    %10 = arith.select %7, %8, %9 : vector<16x128xi1>, vector<16x128xf32>
    %11 = arith.truncf %10 : vector<16x128xf32> to vector<16x128xbf16>
    %c0_7 = arith.constant 0 : index
    %c0_8 = arith.constant 0 : index
    %12 = vector.load %arg5[%c0_7, %c0_8] : memref<128x128xbf16, #tpu.memory_space<vmem>>, vector<128x128xbf16>
    %cst_9 = arith.constant dense<0.000000e+00> : vector<16x128xf32>
    %13 = tpu.matmul %11, %12, %cst_9 {dimension_numbers = #tpu.dot_dimension_numbers<[1], [0], [0], [1], [0, 0, 1, 1], [], []>} : vector<16x128xbf16>, vector<128x128xbf16>, vector<16x128xf32> -> vector<16x128xf32>
    %14 = arith.addf %3, %13 : vector<16x128xf32>
    %c0_10 = arith.constant 0 : index
    %c1 = arith.constant 1 : index
    %15 = vector.load %arg2[%c0_10, %c1] : memref<16x2xi32, #tpu.memory_space<vmem>>, vector<16x1xi32>
    %16 = tpu.iota {dimensions = array<i32: 1>} : vector<16x128xi32>
    %17 = vector.broadcast %15 : vector<16x1xi32> to vector<16x128xi32>
    %18 = arith.cmpi eq, %16, %17 : vector<16x128xi32>
    %cst_11 = arith.constant 1.000000e+00 : f32
    %cst_12 = arith.constant 0.000000e+00 : f32
    %19 = vector.broadcast %cst_11 : f32 to vector<16x128xf32>
    %20 = vector.broadcast %cst_12 : f32 to vector<16x128xf32>
    %21 = arith.select %18, %19, %20 : vector<16x128xi1>, vector<16x128xf32>
    %22 = arith.truncf %21 : vector<16x128xf32> to vector<16x128xbf16>
    %c0_13 = arith.constant 0 : index
    %c0_14 = arith.constant 0 : index
    %23 = vector.load %arg6[%c0_13, %c0_14] : memref<128x128xbf16, #tpu.memory_space<vmem>>, vector<128x128xbf16>
    %cst_15 = arith.constant dense<0.000000e+00> : vector<16x128xf32>
    %24 = tpu.matmul %22, %23, %cst_15 {dimension_numbers = #tpu.dot_dimension_numbers<[1], [0], [0], [1], [0, 0, 1, 1], [], []>} : vector<16x128xbf16>, vector<128x128xbf16>, vector<16x128xf32> -> vector<16x128xf32>
    %25 = arith.addf %14, %24 : vector<16x128xf32>
    %c0_16 = arith.constant 0 : index
    %c0_17 = arith.constant 0 : index
    %26 = vector.load %arg4[%c0_16, %c0_17] : memref<1x128xf32, #tpu.memory_space<vmem>>, vector<1x128xf32>
    %27 = vector.broadcast %26 : vector<1x128xf32> to vector<16x128xf32>
    %28 = arith.addf %25, %27 : vector<16x128xf32>
    %cst_18 = arith.constant 0.000000e+00 : f32
    %29 = vector.broadcast %cst_18 : f32 to vector<16x128xf32>
    %30 = arith.maximumf %28, %29 : vector<16x128xf32>
    %31 = arith.truncf %30 : vector<16x128xf32> to vector<16x128xbf16>
    %c0_19 = arith.constant 0 : index
    %c0_20 = arith.constant 0 : index
    %32 = vector.load %arg7[%c0_19, %c0_20] : memref<128x32xbf16, #tpu.memory_space<vmem>>, vector<128x32xbf16>
    %cst_21 = arith.constant dense<0.000000e+00> : vector<16x32xf32>
    %33 = tpu.matmul %31, %32, %cst_21 {dimension_numbers = #tpu.dot_dimension_numbers<[1], [0], [0], [1], [0, 0, 1, 1], [], []>} : vector<16x128xbf16>, vector<128x32xbf16>, vector<16x32xf32> -> vector<16x32xf32>
    %c0_22 = arith.constant 0 : index
    %c0_23 = arith.constant 0 : index
    %34 = vector.load %arg8[%c0_22, %c0_23] : memref<1x32xf32, #tpu.memory_space<vmem>>, vector<1x32xf32>
    %35 = vector.broadcast %34 : vector<1x32xf32> to vector<16x32xf32>
    %36 = arith.addf %33, %35 : vector<16x32xf32>
    %c0_24 = arith.constant 0 : index
    %c0_25 = arith.constant 0 : index
    %37 = vector.load %arg9[%c0_24, %c0_25] : memref<16x32xf32, #tpu.memory_space<vmem>>, vector<16x32xf32>
    tpu.vector_store %arg9[%c0_24, %c0_25], %36 {strides = array<i32>} : memref<16x32xf32, #tpu.memory_space<vmem>>, vector<16x32xf32>,
    return
  }
  func.func @transform_0(%arg0: i32) -> (i32, i32) {
    %c0_i32 = arith.constant 0 : i32
    %c0_i32_0 = arith.constant 0 : i32
    return %arg0, %c0_i32 : i32, i32
  }
  func.func @transform_1(%arg0: i32) -> (i32, i32) {
    %c0_i32 = arith.constant 0 : i32
    %c0_i32_0 = arith.constant 0 : i32
    return %arg0, %c0_i32 : i32, i32
  }
  func.func @transform_2(%arg0: i32) -> (i32, i32) {
    %c0_i32 = arith.constant 0 : i32
    %c0_i32_0 = arith.constant 0 : i32
    %c0_i32_1 = arith.constant 0 : i32
    return %c0_i32, %c0_i32_0 : i32, i32
  }
  func.func @transform_3(%arg0: i32) -> (i32, i32) {
    %c0_i32 = arith.constant 0 : i32
    %c0_i32_0 = arith.constant 0 : i32
    %c0_i32_1 = arith.constant 0 : i32
    return %c0_i32, %c0_i32_0 : i32, i32
  }
  func.func @transform_4(%arg0: i32) -> (i32, i32) {
    %c0_i32 = arith.constant 0 : i32
    %c0_i32_0 = arith.constant 0 : i32
    %c0_i32_1 = arith.constant 0 : i32
    return %c0_i32, %c0_i32_0 : i32, i32
  }
  func.func @transform_5(%arg0: i32) -> (i32, i32) {
    %c0_i32 = arith.constant 0 : i32
    %c0_i32_0 = arith.constant 0 : i32
    %c0_i32_1 = arith.constant 0 : i32
    return %c0_i32, %c0_i32_0 : i32, i32
  }
  func.func @transform_6(%arg0: i32) -> (i32, i32) {
    %c0_i32 = arith.constant 0 : i32
    %c0_i32_0 = arith.constant 0 : i32
    %c0_i32_1 = arith.constant 0 : i32
    return %c0_i32, %c0_i32_0 : i32, i32
  }
  func.func @transform_7(%arg0: i32) -> (i32, i32) {
    %c0_i32 = arith.constant 0 : i32
    %c0_i32_0 = arith.constant 0 : i32
    %c0_i32_1 = arith.constant 0 : i32
    return %c0_i32, %c0_i32_0 : i32, i32
  }
  func.func @transform_8(%arg0: i32) -> (i32, i32) {
    %c0_i32 = arith.constant 0 : i32
    %c0_i32_0 = arith.constant 0 : i32
    return %arg0, %c0_i32 : i32, i32
  }
}

</mosaic_0001>

<bundles_post_ra>
// kernel: tower_model_forward.1
= control target key start
LH: loop header
LB: loop body
LE: loop exit
PB: predicated region body
PF: predicated region fallthrough
CT: control target
= control target key end

     0   :  { %13 = vsyncpa [#allocation3], 0  ;;  %s761_s0 = inlined_call_operand.vmem [shape: f32[16,16], index: 0, kind: input, shape index: {}]   ;;  %s762_s1 = inlined_call_operand.vmem [shape: s32[16,2], index: 1, kind: input, shape index: {}]   ;;  %s763_s2 = inlined_call_operand.hbm [shape: bf16[16,128], index: 2, kind: input, shape index: {}]   ;;  %s764_s3 = inlined_call_operand.hbm [shape: f32[1,128], index: 3, kind: input, shape index: {}]   ;;  %s765_s4 = inlined_call_operand.hbm [shape: bf16[128,128], index: 4, kind: input, shape index: {}]   ;;  %s766_s5 = inlined_call_operand.hbm [shape: bf16[128,128], index: 5, kind: input, shape index: {}]   ;;  %s767_s6 = inlined_call_operand.vmem [shape: bf16[128,32], index: 6, kind: input, shape index: {}]   ;;  %s768_s7 = inlined_call_operand.vmem [shape: f32[1,32], index: 7, kind: input, shape index: {}]   ;;  %s769_s8 = inlined_call_operand.vmem [shape: f32[16,32], index: 8, kind: output, shape index: {}]  }
   0x1   :  { %14 = vsyncpa [#allocation5], 0  ;;  %s38_s29 = sshll.u32 %s764_s3, 4  ;;  %s39_s29 = int_to_ptr.hbm [resolvable:$true] %s38_s29 }
   0x2   :  { %15 = vsyncpa [#allocation8], 0  ;;  %s650_s30 = smov [#allocation4]   ;;  %s24_s12 = sshll.u32 %s763_s2, 4  ;;  %s25_s12 = int_to_ptr.hbm [resolvable:$true] %s24_s12 }
   0x3   :  { %s40_s9 = sshll.u32 %s650_s30, 4  ;;  %s651_s13 = smov [#allocation2]   ;;  %s41_s9 = int_to_ptr.vmem [resolvable:$true] %s40_s9 }
   0x4   :  { %43 = dma.hbm_to_vmem [thread:$0]  %s39_s29, 16, %s41_s9, [#allocation5]  }
   0x5   :  { %s26_s14 = sshll.u32 %s651_s13, 4  ;;  %s652_s15 = smov 64   ;;  %s27_s14 = int_to_ptr.vmem [resolvable:$true] %s26_s14 }
   0x6   :  { %s653_s16 = smov 4   ;;  %s48_s3 = sshll.u32 %s765_s4, 4  ;;  %s49_s3 = int_to_ptr.hbm [resolvable:$true] %s48_s3 }
   0x7   :  { %32 = dma.hbm_to_vmem [thread:$0]  %s25_s12, 128, %s27_s14, [#allocation3], %s652_s15, %s652_s15, %s653_s16  }
   0x8   :  { %s654_s19 = smov [#allocation6]   ;;  %s61_s2 = sshll.u32 %s766_s5, 4  ;;  %s62_s2 = int_to_ptr.hbm [resolvable:$true] %s61_s2 }
   0x9   :  { %s50_s20 = sshll.u32 %s654_s19, 4  ;;  %s655_s23 = smov [#allocation7]   ;;  %s51_s20 = int_to_ptr.vmem [resolvable:$true] %s50_s20 }
   0xa   :  { %56 = dma.hbm_to_vmem [thread:$0]  %s49_s3, 1024, %s51_s20, [#allocation5], %s652_s15, %s652_s15, %s653_s16  }
   0xb   :  { %s63_s24 = sshll.u32 %s655_s23, 4  ;;  %s64_s24 = int_to_ptr.vmem [resolvable:$true] %s63_s24 }
   0xc   :  { %69 = dma.hbm_to_vmem [thread:$0]  %s62_s2, 1024, %s64_s24, [#allocation8], %s652_s15, %s652_s15, %s653_s16  }
   0xd   :  { %644 = dma.done.wait [#allocation3], 128  }
   0xe   :  { %645 = vsyncadd [#allocation3], 4294967168 }
   0xf   :  { %646 = dma.done.wait [#allocation5], 1040  }
  0x10   :  { %647 = vsyncadd [#allocation5], 4294966256 }
  0x11   :  { %648 = dma.done.wait [#allocation8], 1024  }
  0x12   :  { %649 = vsyncadd [#allocation8], 4294966272  ;;  %v656_v0 = vmov 1   ;;  %v657_v1 = vmov 0   ;;  %v96_v2 = vld [vmem:[%s762_s1] sm:$0xff]  ;;  %v97_v7 = vld [vmem:[%s762_s1 + $0x8] sm:$0xff]  ;;  %v98_v27 = vlaneseq }
  0x13   :  { %544 = vset.pattern.permute.xlu0 %v656_v0  ;;  %545 = vset.pattern.permute.xlu1 %v657_v1  ;;  %v518_v3 = vld [vmem:[#allocation6 + $0x38] sm:$0xff]  ;;  %v517_v5 = vld [vmem:[#allocation6 + $0x30] sm:$0xff]  ;;  %v516_v8 = vld [vmem:[#allocation6 + $0x28] sm:$0xff]  ;;  %vm195_vm0 = vcmask 130048   ;;  %v658_v31 = vmov 1.0|1.0  }
  0x14   :  { %101 = vperm.xlu1 %545, %v96_v2   ;;  %214 = vperm.xlu0 %544, %v96_v2   ;;  %v526_v4 = vld [vmem:[#allocation7 + $0x38] sm:$0xff]  ;;  %v525_v6 = vld [vmem:[#allocation7 + $0x30] sm:$0xff]  ;;  %v524_v9 = vld [vmem:[#allocation7 + $0x28] sm:$0xff]  ;;  %v99_v28 = vand.u32 127, %v98_v27  ;;  %vm395_vm7 = vcmask 261120  }
  0x15   :  { %175 = vmatpush.bf16.msra.mxu0 %v518_v3  ;;  %288 = vmatpush.bf16.msra.mxu2 %v526_v4  ;;  %v515_v10 = vld [vmem:[#allocation6 + $0x20] sm:$0xff]  ;;  %v514_v12 = vld [vmem:[#allocation6 + $0x18] sm:$0xff]  ;;  %v513_v14 = vld [vmem:[#allocation6 + $0x10] sm:$0xff] }
  0x16   :  { %v523_v11 = vld [vmem:[#allocation7 + $0x20] sm:$0xff]  ;;  %v522_v13 = vld [vmem:[#allocation7 + $0x18] sm:$0xff]  ;;  %v521_v15 = vld [vmem:[#allocation7 + $0x10] sm:$0xff] }
  0x17   :  { %v512_v16 = vld [vmem:[#allocation6 + $0x8] sm:$0xff]  ;;  %v510_v17 = vld [vmem:[#allocation2] sm:$0xff]  ;;  %v92_v20 = vld [vmem:[%s761_s0 + $0x8] sm:$0xff] }
  0x18   :  { %v520_v18 = vld [vmem:[#allocation7 + $0x8] sm:$0xff]  ;;  %v91_v19 = vld [vmem:[%s761_s0] sm:$0xff]  ;;  %206 = vmatpush.bf16.msra.mxu1 %v510_v17  ;;  %v511_v22 = vld [vmem:[#allocation6] sm:$0xff] }
  0x19   :  { %176 = vmatpush.bf16.msra.mxu0 %v517_v5  ;;  %289 = vmatpush.bf16.msra.mxu2 %v525_v6  ;;  %v93_v21 = vpack.c.bf16 %v92_v20, %v91_v19  ;;  %v519_v23 = vld [vmem:[#allocation7] sm:$0xff]  ;;  %v534_v24 = vld [vmem:[%s767_s6 + $0x38] sm:$0xff]  ;;  %v531_v34 = vld [vmem:[%s767_s6 + $0x20] sm:$0xff] }
  0x1a   :  { %381 = vmatpush.bf16.msra.mxu3 %v534_v24  ;;  %v533_v32 = vld [vmem:[%s767_s6 + $0x30] sm:$0xff]  ;;  %v532_v33 = vld [vmem:[%s767_s6 + $0x28] sm:$0xff]  ;;  %v530_v35 = vld [vmem:[%s767_s6 + $0x18] sm:$0xff] }
  0x1b   :  { %443 = vmatmul.msk.bf16.vlgmr.msra.gmra.mxu1 %vm195_vm0, %v93_v21  ;;  %v529_v36 = vld [vmem:[%s767_s6 + $0x10] sm:$0xff]  ;;  %v528_v37 = vld [vmem:[%s767_s6 + $0x8] sm:$0xff]  ;;  %v527_v38 = vld [vmem:[%s767_s6] sm:$0xff] }
  0x1c   :  { %104 = vperm.xlu1 %545, %v97_v7   ;;  %217 = vperm.xlu0 %544, %v97_v7   ;;  %v546_v45 = vld [vmem:[#allocation4] ss:$0 sm:$0xff]  ;;  %v547_v55 = vld [vmem:[%s768_s7] ss:$0 sm:$0xff] }
  0x1d   :  { %177 = vmatpush.bf16.msra.mxu0 %v516_v8  ;;  %290 = vmatpush.bf16.msra.mxu2 %v524_v9 }
  0x1e   :  { %382 = vmatpush.bf16.msra.mxu3 %v533_v32 }
  0x21   :  { %178 = vmatpush.bf16.msra.mxu0 %v515_v10  ;;  %291 = vmatpush.bf16.msra.mxu2 %v523_v11 }
  0x22   :  { %383 = vmatpush.bf16.msra.mxu3 %v532_v33 }
  0x25   :  { %179 = vmatpush.bf16.msra.mxu0 %v514_v12  ;;  %292 = vmatpush.bf16.msra.mxu2 %v522_v13 }
  0x26   :  { %384 = vmatpush.bf16.msra.mxu3 %v531_v34 }
  0x29   :  { %180 = vmatpush.bf16.msra.mxu0 %v513_v14  ;;  %293 = vmatpush.bf16.msra.mxu2 %v521_v15 }
  0x2a   :  { %385 = vmatpush.bf16.msra.mxu3 %v530_v35 }
  0x2d   :  { %181 = vmatpush.bf16.msra.mxu0 %v512_v16  ;;  %294 = vmatpush.bf16.msra.mxu2 %v520_v18 }
  0x2e   :  { %386 = vmatpush.bf16.msra.mxu3 %v529_v36 }
  0x31   :  { %182 = vmatpush.bf16.msra.mxu0 %v511_v22  ;;  %295 = vmatpush.bf16.msra.mxu2 %v519_v23 }
  0x32   :  { %387 = vmatpush.bf16.msra.mxu3 %v528_v37 }
  0x36   :  { %388 = vmatpush.bf16.msra.mxu3 %v527_v38 }
  0x86   :  { %v102_v25 = vpop.permute.xlu1 %101  ;;  %v215_v26 = vpop.permute.xlu0 %214 }
  0x87   :  { %vm106_vm1 = vcmp.eq.s32.totalorder %v99_v28, %v102_v25  ;;  %vm219_vm4 = vcmp.eq.s32.totalorder %v99_v28, %v215_v26 }
  0x8e   :  { %v105_v29 = vpop.permute.xlu1 %104  ;;  %v218_v30 = vpop.permute.xlu0 %217 }
  0x8f   :  { %vm107_vm2 = vcmp.eq.s32.totalorder %v99_v28, %v105_v29  ;;  %vm220_vm3 = vcmp.eq.s32.totalorder %v99_v28, %v218_v30 }
  0x90   :  { %vm437_vm5 = vmpackc.low %vm107_vm2, %vm106_vm1 }
  0x91   :  { %vm476_vm6 = vmpackc.low %vm220_vm3, %vm219_vm4  ;;  %438 = vmatmul.msk.bf16.vlgmr.msra.gmra.mxu0 %vm437_vm5, %v658_v31 }
  0x92   :  { %477 = vmatmul.msk.bf16.vlgmr.msra.gmra.mxu2 %vm476_vm6, %v658_v31 }
  0x98   :  { %v208_v40 = vpop.f32.mrf.mxu1 }
  0xa0   :  { %v210_v46 = vpop.f32.mrf.mxu1 }
 0x10e   :  { %v184_v39 = vpop.f32.mrf.mxu0 }
 0x10f   :  { %v209_v42 = vadd.f32 %v208_v40, %v184_v39 }
 0x115   :  { %v297_v41 = vpop.f32.mrf.mxu2 }
 0x116   :  { %v186_v43 = vpop.f32.mrf.mxu0  ;;  %v302_v44 = vadd.f32 %v297_v41, %v209_v42 }
 0x117   :  { %v211_v47 = vadd.f32 %v210_v46, %v186_v43 }
 0x118   :  { %v308_v49 = vadd.f32 %v546_v45, %v302_v44 }
 0x11a   :  { %v310_v52 = vmax.f32 %v308_v49, 0.0 }
 0x11d   :  { %v299_v48 = vpop.f32.mrf.mxu2 }
 0x11e   :  { %v303_v50 = vadd.f32 %v299_v48, %v211_v47 }
 0x120   :  { %v309_v51 = vadd.f32 %v546_v45, %v303_v50 }
 0x122   :  { %v311_v53 = vmax.f32 %v309_v51, 0.0 }
 0x124   :  { %v312_v54 = vpack.c.bf16 %v311_v53, %v310_v52 }
 0x126   :  { %389 = vmatmul.bf16.vlgmr.msra.gmra.mxu3 %v312_v54 }
 0x1a9   :  { %v390_v56 = vpop.f32.mrf.mxu3 }
 0x1aa   :  { %v391_v57 = vadd.f32 %v547_v55, %v390_v56 }
 0x1ac   :  { %396 = vst.msk [vmem:[%s769_s8] sm:$0xff] %vm395_vm7, %v391_v57 }
 0x1b1   :  { %v392_v58 = vpop.f32.mrf.mxu3 }
 0x1b2   :  { %v393_v59 = vadd.f32 %v547_v55, %v392_v58 }
 0x1b4   :  { %397 = vst.msk [vmem:[%s769_s8 + $0x8] sm:$0xff] %vm395_vm7, %v393_v59 }
 0x1b5   :  { %402 = vsyncpa [#allocation3], 1 }
 0x1b6   :  { %403 = vsyncpa [#allocation5], 1 }
 0x1b7   :  { %404 = vsyncpa [#allocation8], 1 }

</bundles_post_ra>
